<compile_context>
chip_gen: v6e
topology: v6e:2x2x1
jax: 0.10.0
libtpu: 0.0.40
codegen_flags: <defaults>
</compile_context>

<pallas_src>
import functools
import math

import jax
import jax.numpy as jnp
from jax.experimental import pallas as pl
from jax.experimental.pallas import tpu as pltpu


# ---------------------------------------------------------------------------
# Fused encoder-layer kernel body (single grid step over the whole problem)
# ---------------------------------------------------------------------------

def _encoder_layer_core(x, pos, wqk_ref, bqk_ref, wv_ref, bv_ref, wo_ref, bo_ref,
                        g1_ref, b1_ref, g2_ref, b2_ref,
                        w1_ref, bb1_ref, w2_ref, bb2_ref,
                        out_ref, attn_scr, *, nhead, batch, eps):
    f32 = jnp.float32
    x = x.astype(f32)                                  # (N, E); row n = s*B + b
    N, E = x.shape
    H = nhead
    Dh = E // H
    cdt = wqk_ref.dtype                                # MXU compute dtype (bf16)

    # ---- LayerNorm 1 (f32) -------------------------------------------------
    mu = jnp.mean(x, axis=-1, keepdims=True)
    var = jnp.mean(jnp.square(x - mu), axis=-1, keepdims=True)
    xn = (x - mu) * jax.lax.rsqrt(var + eps) * g1_ref[...] + b1_ref[...]

    # ---- packed Q/K and V projections on the whole (N, E) slab --------------
    qk_in = xn if pos is None else xn + pos.astype(f32)       # q = k = LN(src)+pos
    qk = jnp.dot(qk_in.astype(cdt), wqk_ref[...],
                 preferred_element_type=f32) + bqk_ref[...]   # (N, 2E)
    v = jnp.dot(xn.astype(cdt), wv_ref[...],
                preferred_element_type=f32) + bv_ref[...]     # value = LN(src)

    qc = qk[:, :E].astype(cdt)          # 1/sqrt(Dh) already folded into Wq/bq
    kc = qk[:, E:].astype(cdt)
    vc = v.astype(cdt)

    # ---- per-sample attention over the flat token axis ----------------------
    # Block-structured bias keeps queries attending only to keys of the same
    # batch element (token n belongs to sample n % batch); avoids any strided
    # row regrouping / relayout inside the kernel.
    if batch > 1:
        rows = jax.lax.broadcasted_iota(jnp.int32, (N, N), 0)
        cols = jax.lax.broadcasted_iota(jnp.int32, (N, N), 1)
        bias = jnp.where((rows % batch) == (cols % batch), 0.0, -1e30).astype(f32)
    else:
        bias = None

    for h in range(H):                  # static unroll; H is small
        sl = slice(h * Dh, (h + 1) * Dh)
        s = jax.lax.dot_general(qc[:, sl], kc[:, sl],
                                (((1,), (1,)), ((), ())),
                                preferred_element_type=f32)    # (N, N)
        if bias is not None:
            s = s + bias
        s = s - jnp.max(s, axis=-1, keepdims=True)
        p = jnp.exp(s)
        p = p / jnp.sum(p, axis=-1, keepdims=True)             # exact softmax
        # head output goes straight into its lane slice (no concatenate)
        attn_scr[:, sl] = jnp.dot(p.astype(cdt), vc[:, sl],
                                  preferred_element_type=f32)

    attn = jnp.dot(attn_scr[...].astype(cdt), wo_ref[...],
                   preferred_element_type=f32) + bo_ref[...]

    # ---- residual 1 + LayerNorm 2 --------------------------------------------
    x = x + attn
    mu2 = jnp.mean(x, axis=-1, keepdims=True)
    var2 = jnp.mean(jnp.square(x - mu2), axis=-1, keepdims=True)
    y = (x - mu2) * jax.lax.rsqrt(var2 + eps) * g2_ref[...] + b2_ref[...]

    # ---- FFN (linear1 -> relu -> linear2) ------------------------------------
    h1 = jnp.dot(y.astype(cdt), w1_ref[...],
                 preferred_element_type=f32) + bb1_ref[...]
    h1 = jnp.maximum(h1, 0.0)
    ffn = jnp.dot(h1.astype(cdt), w2_ref[...],
                  preferred_element_type=f32) + bb2_ref[...]

    # ---- residual 2 + store ---------------------------------------------------
    out_ref[...] = (x + ffn).astype(out_ref.dtype)


def _kernel_with_pos(src_ref, pos_ref, *rest, nhead, batch, eps):
    _encoder_layer_core(src_ref[...], pos_ref[...], *rest,
                        nhead=nhead, batch=batch, eps=eps)


def _kernel_no_pos(src_ref, *rest, nhead, batch, eps):
    _encoder_layer_core(src_ref[...], None, *rest,
                        nhead=nhead, batch=batch, eps=eps)


# ---------------------------------------------------------------------------
# Wrapper: one pallas_call for the whole layer
# ---------------------------------------------------------------------------

def encoder_layer_forward(params, src, pos=None, *, nhead=4, eps=1e-5,
                          compute_dtype=jnp.bfloat16):
    """Fused TransformerEncoderLayer.forward_pre.  src/pos are seq-first (S, B, E)."""
    S, B, E = src.shape
    N = S * B
    Dh = E // nhead
    scale = 1.0 / math.sqrt(Dh)
    F = params["w1"].shape[1]
    f32 = jnp.float32
    cdt = compute_dtype

    # Pack Q and K projections (same input) into one (E, 2E) matmul and fold the
    # 1/sqrt(Dh) attention scale into the Q half.  Weights go to bf16 for the MXU;
    # biases / LayerNorm params stay f32 (applied after f32 accumulation).
    wqk = jnp.concatenate([params["wq"] * scale, params["wk"]], axis=1).astype(cdt)
    bqk = jnp.concatenate([params["bq"] * scale, params["bk"]], axis=0)

    # Free reshape (no transpose, no copy): (S, B, E) -> (S*B, E) token slab.
    operands = [src.reshape(N, E)]
    if pos is not None:
        operands.append(pos.reshape(N, E))
    operands += [
        wqk, bqk.reshape(1, 2 * E).astype(f32),
        params["wv"].astype(cdt), params["bv"].reshape(1, E).astype(f32),
        params["wo"].astype(cdt), params["bo"].reshape(1, E).astype(f32),
        params["norm1_g"].reshape(1, E).astype(f32),
        params["norm1_b"].reshape(1, E).astype(f32),
        params["norm2_g"].reshape(1, E).astype(f32),
        params["norm2_b"].reshape(1, E).astype(f32),
        params["w1"].astype(cdt), params["b1"].reshape(1, F).astype(f32),
        params["w2"].astype(cdt), params["b2"].reshape(1, E).astype(f32),
    ]

    kernel = _kernel_with_pos if pos is not None else _kernel_no_pos
    kernel = functools.partial(kernel, nhead=nhead, batch=B, eps=eps)

    # Single fused grid step: all operands fetched exactly once, whole layer in VMEM.
    # TODO(synk): for production sizes (large S*B or dim_feedforward) add a
    # batch-chunk "parallel" grid axis (v7x megacore), flash-style KV tiling for the
    # attention, and F-chunked FFN accumulation to respect v7x's 64 MiB VMEM.
    in_specs = [pl.BlockSpec(op.shape, lambda i: (0, 0)) for op in operands]

    out2d = pl.pallas_call(
        kernel,
        out_shape=jax.ShapeDtypeStruct((N, E), src.dtype),
        grid=(1,),
        in_specs=in_specs,
        out_specs=pl.BlockSpec((N, E), lambda i: (0, 0)),
        scratch_shapes=[pltpu.VMEM((N, E), jnp.float32)],   # per-head PV slices
        compiler_params=pltpu.CompilerParams(
            dimension_semantics=("arbitrary",),
            vmem_limit_bytes=32 * 1024 * 1024),
    )(*operands)

    return out2d.reshape(S, B, E)


# ---------------------------------------------------------------------------
# Pure-JAX reference (for correctness check)
# ---------------------------------------------------------------------------

def reference_forward(params, src, pos, *, nhead=4, eps=1e-5):
    S, B, E = src.shape
    Dh = E // nhead

    def ln(x, g, b):
        m = x.mean(-1, keepdims=True)
        v = jnp.square(x - m).mean(-1, keepdims=True)
        return (x - m) / jnp.sqrt(v + eps) * g + b

    x2 = ln(src, params["norm1_g"], params["norm1_b"])
    qk_in = x2 + (0.0 if pos is None else pos)
    q = qk_in @ params["wq"] + params["bq"]
    k = qk_in @ params["wk"] + params["bk"]
    v = x2 @ params["wv"] + params["bv"]

    def split(t):  # (S, B, E) -> (B, H, S, Dh)
        return t.reshape(S, B, nhead, Dh).transpose(1, 2, 0, 3)

    qh, kh, vh = split(q), split(k), split(v)
    s = jnp.einsum("bhqd,bhkd->bhqk", qh, kh) / math.sqrt(Dh)
    p = jax.nn.softmax(s, axis=-1)
    o = jnp.einsum("bhqk,bhkd->bhqd", p, vh)
    o = o.transpose(2, 0, 1, 3).reshape(S, B, E)
    x = src + (o @ params["wo"] + params["bo"])

    y = ln(x, params["norm2_g"], params["norm2_b"])
    ffn = jnp.maximum(y @ params["w1"] + params["b1"], 0.0) @ params["w2"] + params["b2"]
    return x + ffn


# ---------------------------------------------------------------------------
# Deterministic parameter init
# ---------------------------------------------------------------------------

def init_params(key, d_model, dff):
    keys = iter(jax.random.split(key, 32))

    def lin(in_d, out_d):
        w = jax.random.normal(next(keys), (in_d, out_d), jnp.float32) * 0.02
        b = jax.random.normal(next(keys), (out_d,), jnp.float32) * 0.02
        return w, b

    p = {}
    p["wq"], p["bq"] = lin(d_model, d_model)
    p["wk"], p["bk"] = lin(d_model, d_model)
    p["wv"], p["bv"] = lin(d_model, d_model)
    p["wo"], p["bo"] = lin(d_model, d_model)
    p["w1"], p["b1"] = lin(d_model, dff)
    p["w2"], p["b2"] = lin(dff, d_model)
    for n in ("norm1", "norm2"):
        p[n + "_g"] = jnp.ones((d_model,), jnp.float32)
        p[n + "_b"] = jnp.zeros((d_model,), jnp.float32)
    return p


# ---------------------------------------------------------------------------

if __name__ == "__main__":
    d_model, nhead, dff = 32, 4, 128
    S, B = 8, 2

    key = jax.random.PRNGKey(0)
    kp, k1, k2 = jax.random.split(key, 3)
    params = init_params(kp, d_model, dff)
    src = jax.random.normal(k1, (S, B, d_model), jnp.float32)
    pos = jax.random.normal(k2, (S, B, d_model), jnp.float32)

    # TODO(synk): attn_mask / key_padding_mask and training-mode dropout are not
    # implemented (inference path, no masks), matching the eval forward.

    fwd = jax.jit(functools.partial(encoder_layer_forward, nhead=nhead))
    out = fwd(params, src, pos)
    jax.block_until_ready(out)

    ref = reference_forward(params, src, pos, nhead=nhead)

    assert out.shape == (S, B, d_model)
    assert jnp.all(jnp.isfinite(out))
    max_err = float(jnp.max(jnp.abs(out - ref)))
    assert jnp.allclose(out, ref, atol=2e-2, rtol=2e-2), max_err
    print("KERNEL_OK")
</pallas_src>

<mosaic_0001>
module attributes {stable_mosaic.version = 11 : i64} {
  func.func @_kernel_with_pos(%arg0: i32, %arg1: memref<16x32xf32, #tpu.memory_space<vmem>>, %arg2: memref<16x32xf32, #tpu.memory_space<vmem>>, %arg3: memref<32x64xbf16, #tpu.memory_space<vmem>>, %arg4: memref<1x64xf32, #tpu.memory_space<vmem>>, %arg5: memref<32x32xbf16, #tpu.memory_space<vmem>>, %arg6: memref<1x32xf32, #tpu.memory_space<vmem>>, %arg7: memref<32x32xbf16, #tpu.memory_space<vmem>>, %arg8: memref<1x32xf32, #tpu.memory_space<vmem>>, %arg9: memref<1x32xf32, #tpu.memory_space<vmem>>, %arg10: memref<1x32xf32, #tpu.memory_space<vmem>>, %arg11: memref<1x32xf32, #tpu.memory_space<vmem>>, %arg12: memref<1x32xf32, #tpu.memory_space<vmem>>, %arg13: memref<32x128xbf16, #tpu.memory_space<vmem>>, %arg14: memref<1x128xf32, #tpu.memory_space<vmem>>, %arg15: memref<128x32xbf16, #tpu.memory_space<vmem>>, %arg16: memref<1x32xf32, #tpu.memory_space<vmem>>, %arg17: memref<16x32xf32, #tpu.memory_space<vmem>>, %arg18: memref<16x32xf32, #tpu.memory_space<vmem>>) attributes {dimension_semantics = [#tpu.dimension_semantics<arbitrary>], iteration_bounds = array<i64: 1>, scalar_prefetch = 0 : i64, scratch_operands = 1 : i64, tpu.core_type = #tpu.core_type<tc>, window_params = [{pipeline_mode = #tpu.pipeline_mode<synchronous>, transform_indices = @transform_0, window_bounds = array<i64: 16, 32>}, {pipeline_mode = #tpu.pipeline_mode<synchronous>, transform_indices = @transform_1, window_bounds = array<i64: 16, 32>}, {pipeline_mode = #tpu.pipeline_mode<synchronous>, transform_indices = @transform_2, window_bounds = array<i64: 32, 64>}, {pipeline_mode = #tpu.pipeline_mode<synchronous>, transform_indices = @transform_3, window_bounds = array<i64: 1, 64>}, {pipeline_mode = #tpu.pipeline_mode<synchronous>, transform_indices = @transform_4, window_bounds = array<i64: 32, 32>}, {pipeline_mode = #tpu.pipeline_mode<synchronous>, transform_indices = @transform_5, window_bounds = array<i64: 1, 32>}, {pipeline_mode = #tpu.pipeline_mode<synchronous>, transform_indices = @transform_6, window_bounds = array<i64: 32, 32>}, {pipeline_mode = #tpu.pipeline_mode<synchronous>, transform_indices = @transform_7, window_bounds = array<i64: 1, 32>}, {pipeline_mode = #tpu.pipeline_mode<synchronous>, transform_indices = @transform_8, window_bounds = array<i64: 1, 32>}, {pipeline_mode = #tpu.pipeline_mode<synchronous>, transform_indices = @transform_9, window_bounds = array<i64: 1, 32>}, {pipeline_mode = #tpu.pipeline_mode<synchronous>, transform_indices = @transform_10, window_bounds = array<i64: 1, 32>}, {pipeline_mode = #tpu.pipeline_mode<synchronous>, transform_indices = @transform_11, window_bounds = array<i64: 1, 32>}, {pipeline_mode = #tpu.pipeline_mode<synchronous>, transform_indices = @transform_12, window_bounds = array<i64: 32, 128>}, {pipeline_mode = #tpu.pipeline_mode<synchronous>, transform_indices = @transform_13, window_bounds = array<i64: 1, 128>}, {pipeline_mode = #tpu.pipeline_mode<synchronous>, transform_indices = @transform_14, window_bounds = array<i64: 128, 32>}, {pipeline_mode = #tpu.pipeline_mode<synchronous>, transform_indices = @transform_15, window_bounds = array<i64: 1, 32>}, {pipeline_mode = #tpu.pipeline_mode<synchronous>, transform_indices = @transform_16, window_bounds = array<i64: 16, 32>}]} {
    %c0 = arith.constant 0 : index
    %c0_0 = arith.constant 0 : index
    %0 = vector.load %arg1[%c0, %c0_0] : memref<16x32xf32, #tpu.memory_space<vmem>>, vector<16x32xf32>
    %c0_1 = arith.constant 0 : index
    %c0_2 = arith.constant 0 : index
    %1 = vector.load %arg2[%c0_1, %c0_2] : memref<16x32xf32, #tpu.memory_space<vmem>>, vector<16x32xf32>
    %cst = arith.constant dense<0.000000e+00> : vector<16xf32>
    %2 = vector.multi_reduction <add>, %0, %cst [1] : vector<16x32xf32> to vector<16xf32>
    %3 = vector.shape_cast %2 : vector<16xf32> to vector<16x1xf32>
    %cst_3 = arith.constant 3.200000e+01 : f32
    %4 = vector.broadcast %cst_3 : f32 to vector<16x1xf32>
    %5 = arith.divf %3, %4 : vector<16x1xf32>
    %6 = vector.broadcast %5 : vector<16x1xf32> to vector<16x32xf32>
    %7 = arith.subf %0, %6 : vector<16x32xf32>
    %8 = arith.mulf %7, %7 : vector<16x32xf32>
    %cst_4 = arith.constant dense<0.000000e+00> : vector<16xf32>
    %9 = vector.multi_reduction <add>, %8, %cst_4 [1] : vector<16x32xf32> to vector<16xf32>
    %10 = vector.shape_cast %9 : vector<16xf32> to vector<16x1xf32>
    %cst_5 = arith.constant 3.200000e+01 : f32
    %11 = vector.broadcast %cst_5 : f32 to vector<16x1xf32>
    %12 = arith.divf %10, %11 : vector<16x1xf32>
    %13 = vector.broadcast %5 : vector<16x1xf32> to vector<16x32xf32>
    %14 = arith.subf %0, %13 : vector<16x32xf32>
    %cst_6 = arith.constant 9.99999974E-6 : f32
    %15 = vector.broadcast %cst_6 : f32 to vector<16x1xf32>
    %16 = arith.addf %12, %15 : vector<16x1xf32>
    %17 = math.rsqrt %16 : vector<16x1xf32>
    %18 = vector.broadcast %17 : vector<16x1xf32> to vector<16x32xf32>
    %19 = arith.mulf %14, %18 : vector<16x32xf32>
    %c0_7 = arith.constant 0 : index
    %c0_8 = arith.constant 0 : index
    %20 = vector.load %arg9[%c0_7, %c0_8] : memref<1x32xf32, #tpu.memory_space<vmem>>, vector<1x32xf32>
    %21 = vector.broadcast %20 : vector<1x32xf32> to vector<16x32xf32>
    %22 = arith.mulf %19, %21 : vector<16x32xf32>
    %c0_9 = arith.constant 0 : index
    %c0_10 = arith.constant 0 : index
    %23 = vector.load %arg10[%c0_9, %c0_10] : memref<1x32xf32, #tpu.memory_space<vmem>>, vector<1x32xf32>
    %24 = vector.broadcast %23 : vector<1x32xf32> to vector<16x32xf32>
    %25 = arith.addf %22, %24 : vector<16x32xf32>
    %26 = arith.addf %25, %1 : vector<16x32xf32>
    %27 = arith.truncf %26 : vector<16x32xf32> to vector<16x32xbf16>
    %c0_11 = arith.constant 0 : index
    %c0_12 = arith.constant 0 : index
    %28 = vector.load %arg3[%c0_11, %c0_12] : memref<32x64xbf16, #tpu.memory_space<vmem>>, vector<32x64xbf16>
    %cst_13 = arith.constant dense<0.000000e+00> : vector<16x64xf32>
    %29 = tpu.matmul %27, %28, %cst_13 {dimension_numbers = #tpu.dot_dimension_numbers<[1], [0], [0], [1], [0, 0, 1, 1], [], []>} : vector<16x32xbf16>, vector<32x64xbf16>, vector<16x64xf32> -> vector<16x64xf32>
    %c0_14 = arith.constant 0 : index
    %c0_15 = arith.constant 0 : index
    %30 = vector.load %arg4[%c0_14, %c0_15] : memref<1x64xf32, #tpu.memory_space<vmem>>, vector<1x64xf32>
    %31 = vector.broadcast %30 : vector<1x64xf32> to vector<16x64xf32>
    %32 = arith.addf %29, %31 : vector<16x64xf32>
    %33 = arith.truncf %25 : vector<16x32xf32> to vector<16x32xbf16>
    %c0_16 = arith.constant 0 : index
    %c0_17 = arith.constant 0 : index
    %34 = vector.load %arg5[%c0_16, %c0_17] : memref<32x32xbf16, #tpu.memory_space<vmem>>, vector<32x32xbf16>
    %cst_18 = arith.constant dense<0.000000e+00> : vector<16x32xf32>
    %35 = tpu.matmul %33, %34, %cst_18 {dimension_numbers = #tpu.dot_dimension_numbers<[1], [0], [0], [1], [0, 0, 1, 1], [], []>} : vector<16x32xbf16>, vector<32x32xbf16>, vector<16x32xf32> -> vector<16x32xf32>
    %c0_19 = arith.constant 0 : index
    %c0_20 = arith.constant 0 : index
    %36 = vector.load %arg6[%c0_19, %c0_20] : memref<1x32xf32, #tpu.memory_space<vmem>>, vector<1x32xf32>
    %37 = vector.broadcast %36 : vector<1x32xf32> to vector<16x32xf32>
    %38 = arith.addf %35, %37 : vector<16x32xf32>
    %39 = vector.extract_strided_slice %32 {offsets = [0, 0], sizes = [16, 32], strides = [1, 1]} : vector<16x64xf32> to vector<16x32xf32>
    %40 = arith.truncf %39 : vector<16x32xf32> to vector<16x32xbf16>
    %41 = vector.extract_strided_slice %32 {offsets = [0, 32], sizes = [16, 32], strides = [1, 1]} : vector<16x64xf32> to vector<16x32xf32>
    %42 = arith.truncf %41 : vector<16x32xf32> to vector<16x32xbf16>
    %43 = arith.truncf %38 : vector<16x32xf32> to vector<16x32xbf16>
    %44 = tpu.iota {dimensions = array<i32: 0>} : vector<16x16xi32>
    %45 = tpu.iota {dimensions = array<i32: 1>} : vector<16x16xi32>
    %c2_i32 = arith.constant 2 : i32
    %c0_i32 = arith.constant 0 : i32
    %46 = arith.cmpi eq, %c2_i32, %c0_i32 : i32
    %c1_i32 = arith.constant 1 : i32
    %47 = arith.select %46, %c1_i32, %c2_i32 : i32
    %48 = vector.broadcast %47 : i32 to vector<16x16xi32>
    %49 = arith.remsi %44, %48 : vector<16x16xi32>
    %c0_i32_21 = arith.constant 0 : i32
    %50 = vector.broadcast %c0_i32_21 : i32 to vector<16x16xi32>
    %51 = arith.cmpi ne, %49, %50 : vector<16x16xi32>
    %c0_i32_22 = arith.constant 0 : i32
    %52 = vector.broadcast %c0_i32_22 : i32 to vector<16x16xi32>
    %53 = arith.cmpi slt, %49, %52 : vector<16x16xi32>
    %c0_i32_23 = arith.constant 0 : i32
    %54 = arith.cmpi slt, %47, %c0_i32_23 : i32
    %55 = vector.broadcast %54 : i1 to vector<16x16xi1>
    %56 = vector.broadcast %55 : vector<16x16xi1> to vector<16x16xi1>
    %57 = arith.xori %53, %56 : vector<16x16xi1>
    %58 = arith.andi %57, %51 : vector<16x16xi1>
    %59 = vector.broadcast %47 : i32 to vector<16x16xi32>
    %60 = arith.addi %49, %59 : vector<16x16xi32>
    %61 = arith.select %58, %60, %49 : vector<16x16xi1>, vector<16x16xi32>
    %c2_i32_24 = arith.constant 2 : i32
    %c0_i32_25 = arith.constant 0 : i32
    %62 = arith.cmpi eq, %c2_i32_24, %c0_i32_25 : i32
    %c1_i32_26 = arith.constant 1 : i32
    %63 = arith.select %62, %c1_i32_26, %c2_i32_24 : i32
    %64 = vector.broadcast %63 : i32 to vector<16x16xi32>
    %65 = arith.remsi %45, %64 : vector<16x16xi32>
    %c0_i32_27 = arith.constant 0 : i32
    %66 = vector.broadcast %c0_i32_27 : i32 to vector<16x16xi32>
    %67 = arith.cmpi ne, %65, %66 : vector<16x16xi32>
    %c0_i32_28 = arith.constant 0 : i32
    %68 = vector.broadcast %c0_i32_28 : i32 to vector<16x16xi32>
    %69 = arith.cmpi slt, %65, %68 : vector<16x16xi32>
    %c0_i32_29 = arith.constant 0 : i32
    %70 = arith.cmpi slt, %63, %c0_i32_29 : i32
    %71 = vector.broadcast %70 : i1 to vector<16x16xi1>
    %72 = vector.broadcast %71 : vector<16x16xi1> to vector<16x16xi1>
    %73 = arith.xori %69, %72 : vector<16x16xi1>
    %74 = arith.andi %73, %67 : vector<16x16xi1>
    %75 = vector.broadcast %63 : i32 to vector<16x16xi32>
    %76 = arith.addi %65, %75 : vector<16x16xi32>
    %77 = arith.select %74, %76, %65 : vector<16x16xi1>, vector<16x16xi32>
    %78 = arith.cmpi eq, %61, %77 : vector<16x16xi32>
    %cst_30 = arith.constant 0.000000e+00 : f32
    %cst_31 = arith.constant -1.000000e+30 : f32
    %79 = vector.broadcast %cst_30 : f32 to vector<16x16xf32>
    %80 = vector.broadcast %cst_31 : f32 to vector<16x16xf32>
    %81 = arith.select %78, %79, %80 : vector<16x16xi1>, vector<16x16xf32>
    %82 = vector.extract_strided_slice %40 {offsets = [0, 0], sizes = [16, 8], strides = [1, 1]} : vector<16x32xbf16> to vector<16x8xbf16>
    %83 = vector.extract_strided_slice %42 {offsets = [0, 0], sizes = [16, 8], strides = [1, 1]} : vector<16x32xbf16> to vector<16x8xbf16>
    %cst_32 = arith.constant dense<0.000000e+00> : vector<16x16xf32>
    %84 = tpu.matmul %82, %83, %cst_32 {dimension_numbers = #tpu.dot_dimension_numbers<[1], [1], [0], [0], [0, 0, 1, 0], [], []>} : vector<16x8xbf16>, vector<16x8xbf16>, vector<16x16xf32> -> vector<16x16xf32>
    %85 = arith.addf %84, %81 : vector<16x16xf32>
    %cst_33 = arith.constant dense<0xFF800000> : vector<16xf32>
    %86 = vector.multi_reduction <maximumf>, %85, %cst_33 [1] : vector<16x16xf32> to vector<16xf32>
    %87 = vector.shape_cast %86 : vector<16xf32> to vector<16x1xf32>
    %88 = vector.broadcast %87 : vector<16x1xf32> to vector<16x16xf32>
    %89 = arith.subf %85, %88 : vector<16x16xf32>
    %90 = math.exp %89 : vector<16x16xf32>
    %cst_34 = arith.constant dense<0.000000e+00> : vector<16xf32>
    %91 = vector.multi_reduction <add>, %90, %cst_34 [1] : vector<16x16xf32> to vector<16xf32>
    %92 = vector.shape_cast %91 : vector<16xf32> to vector<16x1xf32>
    %93 = vector.broadcast %92 : vector<16x1xf32> to vector<16x16xf32>
    %94 = arith.divf %90, %93 : vector<16x16xf32>
    %95 = arith.truncf %94 : vector<16x16xf32> to vector<16x16xbf16>
    %96 = vector.extract_strided_slice %43 {offsets = [0, 0], sizes = [16, 8], strides = [1, 1]} : vector<16x32xbf16> to vector<16x8xbf16>
    %cst_35 = arith.constant dense<0.000000e+00> : vector<16x8xf32>
    %97 = tpu.matmul %95, %96, %cst_35 {dimension_numbers = #tpu.dot_dimension_numbers<[1], [0], [0], [1], [0, 0, 1, 1], [], []>} : vector<16x16xbf16>, vector<16x8xbf16>, vector<16x8xf32> -> vector<16x8xf32>
    %c0_36 = arith.constant 0 : index
    %c0_37 = arith.constant 0 : index
    %98 = vector.load %arg18[%c0_36, %c0_37] : memref<16x32xf32, #tpu.memory_space<vmem>>, vector<16x8xf32>
    tpu.vector_store %arg18[%c0_36, %c0_37], %97 {strides = array<i32>} : memref<16x32xf32, #tpu.memory_space<vmem>>, vector<16x8xf32>,
    %99 = vector.extract_strided_slice %40 {offsets = [0, 8], sizes = [16, 8], strides = [1, 1]} : vector<16x32xbf16> to vector<16x8xbf16>
    %100 = vector.extract_strided_slice %42 {offsets = [0, 8], sizes = [16, 8], strides = [1, 1]} : vector<16x32xbf16> to vector<16x8xbf16>
    %cst_38 = arith.constant dense<0.000000e+00> : vector<16x16xf32>
    %101 = tpu.matmul %99, %100, %cst_38 {dimension_numbers = #tpu.dot_dimension_numbers<[1], [1], [0], [0], [0, 0, 1, 0], [], []>} : vector<16x8xbf16>, vector<16x8xbf16>, vector<16x16xf32> -> vector<16x16xf32>
    %102 = arith.addf %101, %81 : vector<16x16xf32>
    %cst_39 = arith.constant dense<0xFF800000> : vector<16xf32>
    %103 = vector.multi_reduction <maximumf>, %102, %cst_39 [1] : vector<16x16xf32> to vector<16xf32>
    %104 = vector.shape_cast %103 : vector<16xf32> to vector<16x1xf32>
    %105 = vector.broadcast %104 : vector<16x1xf32> to vector<16x16xf32>
    %106 = arith.subf %102, %105 : vector<16x16xf32>
    %107 = math.exp %106 : vector<16x16xf32>
    %cst_40 = arith.constant dense<0.000000e+00> : vector<16xf32>
    %108 = vector.multi_reduction <add>, %107, %cst_40 [1] : vector<16x16xf32> to vector<16xf32>
    %109 = vector.shape_cast %108 : vector<16xf32> to vector<16x1xf32>
    %110 = vector.broadcast %109 : vector<16x1xf32> to vector<16x16xf32>
    %111 = arith.divf %107, %110 : vector<16x16xf32>
    %112 = arith.truncf %111 : vector<16x16xf32> to vector<16x16xbf16>
    %113 = vector.extract_strided_slice %43 {offsets = [0, 8], sizes = [16, 8], strides = [1, 1]} : vector<16x32xbf16> to vector<16x8xbf16>
    %cst_41 = arith.constant dense<0.000000e+00> : vector<16x8xf32>
    %114 = tpu.matmul %112, %113, %cst_41 {dimension_numbers = #tpu.dot_dimension_numbers<[1], [0], [0], [1], [0, 0, 1, 1], [], []>} : vector<16x16xbf16>, vector<16x8xbf16>, vector<16x8xf32> -> vector<16x8xf32>
    %c0_42 = arith.constant 0 : index
    %c8 = arith.constant 8 : index
    %115 = vector.load %arg18[%c0_42, %c8] : memref<16x32xf32, #tpu.memory_space<vmem>>, vector<16x8xf32>
    tpu.vector_store %arg18[%c0_42, %c8], %114 {strides = array<i32>} : memref<16x32xf32, #tpu.memory_space<vmem>>, vector<16x8xf32>,
    %116 = vector.extract_strided_slice %40 {offsets = [0, 16], sizes = [16, 8], strides = [1, 1]} : vector<16x32xbf16> to vector<16x8xbf16>
    %117 = vector.extract_strided_slice %42 {offsets = [0, 16], sizes = [16, 8], strides = [1, 1]} : vector<16x32xbf16> to vector<16x8xbf16>
    %cst_43 = arith.constant dense<0.000000e+00> : vector<16x16xf32>
    %118 = tpu.matmul %116, %117, %cst_43 {dimension_numbers = #tpu.dot_dimension_numbers<[1], [1], [0], [0], [0, 0, 1, 0], [], []>} : vector<16x8xbf16>, vector<16x8xbf16>, vector<16x16xf32> -> vector<16x16xf32>
    %119 = arith.addf %118, %81 : vector<16x16xf32>
    %cst_44 = arith.constant dense<0xFF800000> : vector<16xf32>
    %120 = vector.multi_reduction <maximumf>, %119, %cst_44 [1] : vector<16x16xf32> to vector<16xf32>
    %121 = vector.shape_cast %120 : vector<16xf32> to vector<16x1xf32>
    %122 = vector.broadcast %121 : vector<16x1xf32> to vector<16x16xf32>
    %123 = arith.subf %119, %122 : vector<16x16xf32>
    %124 = math.exp %123 : vector<16x16xf32>
    %cst_45 = arith.constant dense<0.000000e+00> : vector<16xf32>
    %125 = vector.multi_reduction <add>, %124, %cst_45 [1] : vector<16x16xf32> to vector<16xf32>
    %126 = vector.shape_cast %125 : vector<16xf32> to vector<16x1xf32>
    %127 = vector.broadcast %126 : vector<16x1xf32> to vector<16x16xf32>
    %128 = arith.divf %124, %127 : vector<16x16xf32>
    %129 = arith.truncf %128 : vector<16x16xf32> to vector<16x16xbf16>
    %130 = vector.extract_strided_slice %43 {offsets = [0, 16], sizes = [16, 8], strides = [1, 1]} : vector<16x32xbf16> to vector<16x8xbf16>
    %cst_46 = arith.constant dense<0.000000e+00> : vector<16x8xf32>
    %131 = tpu.matmul %129, %130, %cst_46 {dimension_numbers = #tpu.dot_dimension_numbers<[1], [0], [0], [1], [0, 0, 1, 1], [], []>} : vector<16x16xbf16>, vector<16x8xbf16>, vector<16x8xf32> -> vector<16x8xf32>
    %c0_47 = arith.constant 0 : index
    %c16 = arith.constant 16 : index
    %132 = vector.load %arg18[%c0_47, %c16] : memref<16x32xf32, #tpu.memory_space<vmem>>, vector<16x8xf32>
    tpu.vector_store %arg18[%c0_47, %c16], %131 {strides = array<i32>} : memref<16x32xf32, #tpu.memory_space<vmem>>, vector<16x8xf32>,
    %133 = vector.extract_strided_slice %40 {offsets = [0, 24], sizes = [16, 8], strides = [1, 1]} : vector<16x32xbf16> to vector<16x8xbf16>
    %134 = vector.extract_strided_slice %42 {offsets = [0, 24], sizes = [16, 8], strides = [1, 1]} : vector<16x32xbf16> to vector<16x8xbf16>
    %cst_48 = arith.constant dense<0.000000e+00> : vector<16x16xf32>
    %135 = tpu.matmul %133, %134, %cst_48 {dimension_numbers = #tpu.dot_dimension_numbers<[1], [1], [0], [0], [0, 0, 1, 0], [], []>} : vector<16x8xbf16>, vector<16x8xbf16>, vector<16x16xf32> -> vector<16x16xf32>
    %136 = arith.addf %135, %81 : vector<16x16xf32>
    %cst_49 = arith.constant dense<0xFF800000> : vector<16xf32>
    %137 = vector.multi_reduction <maximumf>, %136, %cst_49 [1] : vector<16x16xf32> to vector<16xf32>
    %138 = vector.shape_cast %137 : vector<16xf32> to vector<16x1xf32>
    %139 = vector.broadcast %138 : vector<16x1xf32> to vector<16x16xf32>
    %140 = arith.subf %136, %139 : vector<16x16xf32>
    %141 = math.exp %140 : vector<16x16xf32>
    %cst_50 = arith.constant dense<0.000000e+00> : vector<16xf32>
    %142 = vector.multi_reduction <add>, %141, %cst_50 [1] : vector<16x16xf32> to vector<16xf32>
    %143 = vector.shape_cast %142 : vector<16xf32> to vector<16x1xf32>
    %144 = vector.broadcast %143 : vector<16x1xf32> to vector<16x16xf32>
    %145 = arith.divf %141, %144 : vector<16x16xf32>
    %146 = arith.truncf %145 : vector<16x16xf32> to vector<16x16xbf16>
    %147 = vector.extract_strided_slice %43 {offsets = [0, 24], sizes = [16, 8], strides = [1, 1]} : vector<16x32xbf16> to vector<16x8xbf16>
    %cst_51 = arith.constant dense<0.000000e+00> : vector<16x8xf32>
    %148 = tpu.matmul %146, %147, %cst_51 {dimension_numbers = #tpu.dot_dimension_numbers<[1], [0], [0], [1], [0, 0, 1, 1], [], []>} : vector<16x16xbf16>, vector<16x8xbf16>, vector<16x8xf32> -> vector<16x8xf32>
    %c0_52 = arith.constant 0 : index
    %c24 = arith.constant 24 : index
    %149 = vector.load %arg18[%c0_52, %c24] : memref<16x32xf32, #tpu.memory_space<vmem>>, vector<16x8xf32>
    tpu.vector_store %arg18[%c0_52, %c24], %148 {strides = array<i32>} : memref<16x32xf32, #tpu.memory_space<vmem>>, vector<16x8xf32>,
    %c0_53 = arith.constant 0 : index
    %c0_54 = arith.constant 0 : index
    %150 = vector.load %arg18[%c0_53, %c0_54] : memref<16x32xf32, #tpu.memory_space<vmem>>, vector<16x32xf32>
    %151 = arith.truncf %150 : vector<16x32xf32> to vector<16x32xbf16>
    %c0_55 = arith.constant 0 : index
    %c0_56 = arith.constant 0 : index
    %152 = vector.load %arg7[%c0_55, %c0_56] : memref<32x32xbf16, #tpu.memory_space<vmem>>, vector<32x32xbf16>
    %cst_57 = arith.constant dense<0.000000e+00> : vector<16x32xf32>
    %153 = tpu.matmul %151, %152, %cst_57 {dimension_numbers = #tpu.dot_dimension_numbers<[1], [0], [0], [1], [0, 0, 1, 1], [], []>} : vector<16x32xbf16>, vector<32x32xbf16>, vector<16x32xf32> -> vector<16x32xf32>
    %c0_58 = arith.constant 0 : index
    %c0_59 = arith.constant 0 : index
    %154 = vector.load %arg8[%c0_58, %c0_59] : memref<1x32xf32, #tpu.memory_space<vmem>>, vector<1x32xf32>
    %155 = vector.broadcast %154 : vector<1x32xf32> to vector<16x32xf32>
    %156 = arith.addf %153, %155 : vector<16x32xf32>
    %157 = arith.addf %0, %156 : vector<16x32xf32>
    %cst_60 = arith.constant dense<0.000000e+00> : vector<16xf32>
    %158 = vector.multi_reduction <add>, %157, %cst_60 [1] : vector<16x32xf32> to vector<16xf32>
    %159 = vector.shape_cast %158 : vector<16xf32> to vector<16x1xf32>
    %cst_61 = arith.constant 3.200000e+01 : f32
    %160 = vector.broadcast %cst_61 : f32 to vector<16x1xf32>
    %161 = arith.divf %159, %160 : vector<16x1xf32>
    %162 = vector.broadcast %161 : vector<16x1xf32> to vector<16x32xf32>
    %163 = arith.subf %157, %162 : vector<16x32xf32>
    %164 = arith.mulf %163, %163 : vector<16x32xf32>
    %cst_62 = arith.constant dense<0.000000e+00> : vector<16xf32>
    %165 = vector.multi_reduction <add>, %164, %cst_62 [1] : vector<16x32xf32> to vector<16xf32>
    %166 = vector.shape_cast %165 : vector<16xf32> to vector<16x1xf32>
    %cst_63 = arith.constant 3.200000e+01 : f32
    %167 = vector.broadcast %cst_63 : f32 to vector<16x1xf32>
    %168 = arith.divf %166, %167 : vector<16x1xf32>
    %169 = vector.broadcast %161 : vector<16x1xf32> to vector<16x32xf32>
    %170 = arith.subf %157, %169 : vector<16x32xf32>
    %cst_64 = arith.constant 9.99999974E-6 : f32
    %171 = vector.broadcast %cst_64 : f32 to vector<16x1xf32>
    %172 = arith.addf %168, %171 : vector<16x1xf32>
    %173 = math.rsqrt %172 : vector<16x1xf32>
    %174 = vector.broadcast %173 : vector<16x1xf32> to vector<16x32xf32>
    %175 = arith.mulf %170, %174 : vector<16x32xf32>
    %c0_65 = arith.constant 0 : index
    %c0_66 = arith.constant 0 : index
    %176 = vector.load %arg11[%c0_65, %c0_66] : memref<1x32xf32, #tpu.memory_space<vmem>>, vector<1x32xf32>
    %177 = vector.broadcast %176 : vector<1x32xf32> to vector<16x32xf32>
    %178 = arith.mulf %175, %177 : vector<16x32xf32>
    %c0_67 = arith.constant 0 : index
    %c0_68 = arith.constant 0 : index
    %179 = vector.load %arg12[%c0_67, %c0_68] : memref<1x32xf32, #tpu.memory_space<vmem>>, vector<1x32xf32>
    %180 = vector.broadcast %179 : vector<1x32xf32> to vector<16x32xf32>
    %181 = arith.addf %178, %180 : vector<16x32xf32>
    %182 = arith.truncf %181 : vector<16x32xf32> to vector<16x32xbf16>
    %c0_69 = arith.constant 0 : index
    %c0_70 = arith.constant 0 : index
    %183 = vector.load %arg13[%c0_69, %c0_70] : memref<32x128xbf16, #tpu.memory_space<vmem>>, vector<32x128xbf16>
    %cst_71 = arith.constant dense<0.000000e+00> : vector<16x128xf32>
    %184 = tpu.matmul %182, %183, %cst_71 {dimension_numbers = #tpu.dot_dimension_numbers<[1], [0], [0], [1], [0, 0, 1, 1], [], []>} : vector<16x32xbf16>, vector<32x128xbf16>, vector<16x128xf32> -> vector<16x128xf32>
    %c0_72 = arith.constant 0 : index
    %c0_73 = arith.constant 0 : index
    %185 = vector.load %arg14[%c0_72, %c0_73] : memref<1x128xf32, #tpu.memory_space<vmem>>, vector<1x128xf32>
    %186 = vector.broadcast %185 : vector<1x128xf32> to vector<16x128xf32>
    %187 = arith.addf %184, %186 : vector<16x128xf32>
    %cst_74 = arith.constant 0.000000e+00 : f32
    %188 = vector.broadcast %cst_74 : f32 to vector<16x128xf32>
    %189 = arith.maximumf %187, %188 : vector<16x128xf32>
    %190 = arith.truncf %189 : vector<16x128xf32> to vector<16x128xbf16>
    %c0_75 = arith.constant 0 : index
    %c0_76 = arith.constant 0 : index
    %191 = vector.load %arg15[%c0_75, %c0_76] : memref<128x32xbf16, #tpu.memory_space<vmem>>, vector<128x32xbf16>
    %cst_77 = arith.constant dense<0.000000e+00> : vector<16x32xf32>
    %192 = tpu.matmul %190, %191, %cst_77 {dimension_numbers = #tpu.dot_dimension_numbers<[1], [0], [0], [1], [0, 0, 1, 1], [], []>} : vector<16x128xbf16>, vector<128x32xbf16>, vector<16x32xf32> -> vector<16x32xf32>
    %c0_78 = arith.constant 0 : index
    %c0_79 = arith.constant 0 : index
    %193 = vector.load %arg16[%c0_78, %c0_79] : memref<1x32xf32, #tpu.memory_space<vmem>>, vector<1x32xf32>
    %194 = vector.broadcast %193 : vector<1x32xf32> to vector<16x32xf32>
    %195 = arith.addf %192, %194 : vector<16x32xf32>
    %196 = arith.addf %157, %195 : vector<16x32xf32>
    %c0_80 = arith.constant 0 : index
    %c0_81 = arith.constant 0 : index
    %197 = vector.load %arg17[%c0_80, %c0_81] : memref<16x32xf32, #tpu.memory_space<vmem>>, vector<16x32xf32>
    tpu.vector_store %arg17[%c0_80, %c0_81], %196 {strides = array<i32>} : memref<16x32xf32, #tpu.memory_space<vmem>>, vector<16x32xf32>,
    return
  }
  func.func @transform_0(%arg0: i32) -> (i32, i32) {
    %c0_i32 = arith.constant 0 : i32
    %c0_i32_0 = arith.constant 0 : i32
    %c0_i32_1 = arith.constant 0 : i32
    return %c0_i32, %c0_i32_0 : i32, i32
  }
  func.func @transform_1(%arg0: i32) -> (i32, i32) {
    %c0_i32 = arith.constant 0 : i32
    %c0_i32_0 = arith.constant 0 : i32
    %c0_i32_1 = arith.constant 0 : i32
    return %c0_i32, %c0_i32_0 : i32, i32
  }
  func.func @transform_2(%arg0: i32) -> (i32, i32) {
    %c0_i32 = arith.constant 0 : i32
    %c0_i32_0 = arith.constant 0 : i32
    %c0_i32_1 = arith.constant 0 : i32
    return %c0_i32, %c0_i32_0 : i32, i32
  }
  func.func @transform_3(%arg0: i32) -> (i32, i32) {
    %c0_i32 = arith.constant 0 : i32
    %c0_i32_0 = arith.constant 0 : i32
    %c0_i32_1 = arith.constant 0 : i32
    return %c0_i32, %c0_i32_0 : i32, i32
  }
  func.func @transform_4(%arg0: i32) -> (i32, i32) {
    %c0_i32 = arith.constant 0 : i32
    %c0_i32_0 = arith.constant 0 : i32
    %c0_i32_1 = arith.constant 0 : i32
    return %c0_i32, %c0_i32_0 : i32, i32
  }
  func.func @transform_5(%arg0: i32) -> (i32, i32) {
    %c0_i32 = arith.constant 0 : i32
    %c0_i32_0 = arith.constant 0 : i32
    %c0_i32_1 = arith.constant 0 : i32
    return %c0_i32, %c0_i32_0 : i32, i32
  }
  func.func @transform_6(%arg0: i32) -> (i32, i32) {
    %c0_i32 = arith.constant 0 : i32
    %c0_i32_0 = arith.constant 0 : i32
    %c0_i32_1 = arith.constant 0 : i32
    return %c0_i32, %c0_i32_0 : i32, i32
  }
  func.func @transform_7(%arg0: i32) -> (i32, i32) {
    %c0_i32 = arith.constant 0 : i32
    %c0_i32_0 = arith.constant 0 : i32
    %c0_i32_1 = arith.constant 0 : i32
    return %c0_i32, %c0_i32_0 : i32, i32
  }
  func.func @transform_8(%arg0: i32) -> (i32, i32) {
    %c0_i32 = arith.constant 0 : i32
    %c0_i32_0 = arith.constant 0 : i32
    %c0_i32_1 = arith.constant 0 : i32
    return %c0_i32, %c0_i32_0 : i32, i32
  }
  func.func @transform_9(%arg0: i32) -> (i32, i32) {
    %c0_i32 = arith.constant 0 : i32
    %c0_i32_0 = arith.constant 0 : i32
    %c0_i32_1 = arith.constant 0 : i32
    return %c0_i32, %c0_i32_0 : i32, i32
  }
  func.func @transform_10(%arg0: i32) -> (i32, i32) {
    %c0_i32 = arith.constant 0 : i32
    %c0_i32_0 = arith.constant 0 : i32
    %c0_i32_1 = arith.constant 0 : i32
    return %c0_i32, %c0_i32_0 : i32, i32
  }
  func.func @transform_11(%arg0: i32) -> (i32, i32) {
    %c0_i32 = arith.constant 0 : i32
    %c0_i32_0 = arith.constant 0 : i32
    %c0_i32_1 = arith.constant 0 : i32
    return %c0_i32, %c0_i32_0 : i32, i32
  }
  func.func @transform_12(%arg0: i32) -> (i32, i32) {
    %c0_i32 = arith.constant 0 : i32
    %c0_i32_0 = arith.constant 0 : i32
    %c0_i32_1 = arith.constant 0 : i32
    return %c0_i32, %c0_i32_0 : i32, i32
  }
  func.func @transform_13(%arg0: i32) -> (i32, i32) {
    %c0_i32 = arith.constant 0 : i32
    %c0_i32_0 = arith.constant 0 : i32
    %c0_i32_1 = arith.constant 0 : i32
    return %c0_i32, %c0_i32_0 : i32, i32
  }
  func.func @transform_14(%arg0: i32) -> (i32, i32) {
    %c0_i32 = arith.constant 0 : i32
    %c0_i32_0 = arith.constant 0 : i32
    %c0_i32_1 = arith.constant 0 : i32
    return %c0_i32, %c0_i32_0 : i32, i32
  }
  func.func @transform_15(%arg0: i32) -> (i32, i32) {
    %c0_i32 = arith.constant 0 : i32
    %c0_i32_0 = arith.constant 0 : i32
    %c0_i32_1 = arith.constant 0 : i32
    return %c0_i32, %c0_i32_0 : i32, i32
  }
  func.func @transform_16(%arg0: i32) -> (i32, i32) {
    %c0_i32 = arith.constant 0 : i32
    %c0_i32_0 = arith.constant 0 : i32
    %c0_i32_1 = arith.constant 0 : i32
    return %c0_i32, %c0_i32_0 : i32, i32
  }
}

</mosaic_0001>

<bundles_post_ra>
// kernel: encoder_layer_forward.1
= control target key start
LH: loop header
LB: loop body
LE: loop exit
PB: predicated region body
PF: predicated region fallthrough
CT: control target
= control target key end

     0   :  { %s1729_s0 = inlined_call_operand.vmem [shape: f32[16,32], index: 0, kind: input, shape index: {}]   ;;  %s1730_s1 = inlined_call_operand.vmem [shape: f32[16,32], index: 1, kind: input, shape index: {}]   ;;  %s1731_s2 = inlined_call_operand.vmem [shape: bf16[32,64], index: 2, kind: input, shape index: {}]   ;;  %s1732_s3 = inlined_call_operand.vmem [shape: f32[1,64], index: 3, kind: input, shape index: {}]   ;;  %s1733_s4 = inlined_call_operand.vmem [shape: bf16[32,32], index: 4, kind: input, shape index: {}]   ;;  %s1734_s5 = inlined_call_operand.vmem [shape: f32[1,32], index: 5, kind: input, shape index: {}]   ;;  %s1735_s6 = inlined_call_operand.vmem [shape: bf16[32,32], index: 6, kind: input, shape index: {}]   ;;  %s1736_s7 = inlined_call_operand.vmem [shape: f32[1,32], index: 7, kind: input, shape index: {}]   ;;  %s1737_s8 = inlined_call_operand.vmem [shape: f32[1,32], index: 8, kind: input, shape index: {}]   ;;  %s1738_s9 = inlined_call_operand.vmem [shape: f32[1,32], index: 9, kind: input, shape index: {}]   ;;  %s1739_s10 = inlined_call_operand.vmem [shape: f32[1,32], index: 10, kind: input, shape index: {}]   ;;  %s1740_s11 = inlined_call_operand.vmem [shape: f32[1,32], index: 11, kind: input, shape index: {}]   ;;  %s1741_s12 = inlined_call_operand.vmem [shape: bf16[32,128], index: 12, kind: input, shape index: {}]   ;;  %s1742_s13 = inlined_call_operand.vmem [shape: f32[1,128], index: 13, kind: input, shape index: {}]   ;;  %s1743_s14 = inlined_call_operand.vmem [shape: bf16[128,32], index: 14, kind: input, shape index: {}]   ;;  %s1744_s15 = inlined_call_operand.vmem [shape: f32[1,32], index: 15, kind: input, shape index: {}]   ;;  %s1745_s16 = inlined_call_operand.hbm [shape: f32[16,32], index: 16, kind: output, shape index: {}]  }
   0x1   :  { %1747 = sst [smem:[#allocation6_spill]] %s1729_s0 }
   0x2   :  { %s1748_s23 = sld [smem:[#allocation6_spill]]  ;;  %vm59_vm0 = vcmask 261120  }
   0x8   :  { %v1497_v0 = vld [vmem:[%s1748_s23] sm:$0xff]  ;;  %v1502_v1 = vld [vmem:[%s1748_s23 + $0x8] sm:$0xff] }
   0x9   :  { %v60_v2 = vsel %vm59_vm0, %v1497_v0, 0.0  ;;  %v63_v3 = vsel %vm59_vm0, %v1502_v1, 0.0 }
   0xa   :  { %61 = vadd.xlane.f32.xlu0 %v60_v2 }
   0xe   :  { %64 = vadd.xlane.f32.xlu0 %v63_v3 }
   0xf   :  { %21 = vsyncpa [#allocation4], 0  ;;  %v1316_v14 = vld [vmem:[%s1731_s2 + $0x8] sm:$0xff]   ;;  %v1394_v15 = vmov 0.0   ;;  %vm1395_vm1 = vmmov 0   ;;  %v1317_v16 = vld [vmem:[%s1731_s2] sm:$0xff]  }
  0x10   :  { %1201 = vmatprep.subr.bf16.mxu1 %v1394_v15  ;;  %1205 = vmatprep.mubr.msk.bf16.mxu1 %vm1395_vm1, %v1394_v15  ;;  %v1127_v24 = vld [vmem:[%s1737_s8] ss:$0 sm:$0xff]  ;;  %v58_v33 = vld [vmem:[%s1730_s1 + $0x8] sm:$0xff]  ;;  %s1397_s25 = smov 96   ;;  %s1399_s28 = smov 112   ;;  %vm293_vm2 = vcmask 64512  }
  0x11   :  { %1202 = vmatpush3.bf16.msra.mxu1 %v1316_v14  ;;  %1229 = vmatprep.subr.bf16.mxu0 %v1394_v15  ;;  %v1128_v28 = vld [vmem:[%s1738_s9] ss:$0 sm:$0xff]  ;;  %v1318_v37 = vld [vmem:[%s1733_s4 + $0x8] sm:$0xff]   ;;  %s1400_s29 = smov 80   ;;  %s1401_s2 = smov 104   ;;  %vm341_vm5 = vcmask 130048  }
  0x12   :  { %1203 = vmatprep.subr.bf16.mxu1 %v1394_v15  ;;  %1231 = vmatprep.mubr.msk.bf16.mxu0 %vm1395_vm1, %v1394_v15  ;;  %v57_v32 = vld [vmem:[%s1730_s1] sm:$0xff]  ;;  %s1402_s30 = smov 72   ;;  %s1405_s18 = smov 16   ;;  %vm541_vm6 = vcmask 130112   ;;  %vm673_vm7 = vcmask 195712   ;;  %vm805_vm8 = vcmask 261312  }
  0x13   :  { %v1319_v39 = vld [vmem:[%s1733_s4] sm:$0xff]   ;;  %s1396_s4 = smov 88   ;;  %s1406_s21 = smov 24  }
  0x14   :  { %v1129_v42 = vld [vmem:[%s1732_s3] ss:$0 sm:$0xff]  ;;  %s1398_s3 = smov 120  }
  0x15   :  { %1204 = vmatpush3.bf16.msra.mxu1 %v1317_v16  ;;  %v1133_v50 = vld [vmem:[%s1734_s5] ss:$0 sm:$0xff]  ;;  %s1404_s5 = smov 8  }
  0x16   :  { %1209 = vmatprep.subr.bf16.mxu1 %v1394_v15 }
  0x93   :  { %v62_v4 = vpop.xlane.xlu0 %61 }
  0x94   :  { %v67_v5 = vmul.f32 0.03125, %v62_v4 }
  0x96   :  { %v69_v6 = vsub.f32 %v1497_v0, %v67_v5 }
  0x97   :  { %v65_v7 = vpop.xlane.xlu0 %64 }
  0x98   :  { %v68_v8 = vmul.f32 0.03125, %v65_v7  ;;  %v71_v9 = vmul.f32 %v69_v6, %v69_v6 }
  0x9a   :  { %v70_v10 = vsub.f32 %v1502_v1, %v68_v8  ;;  %v73_v11 = vsel %vm59_vm0, %v71_v9, 0.0 }
  0x9b   :  { %74 = vadd.xlane.f32.xlu1 %v73_v11 }
  0x9c   :  { %v72_v12 = vmul.f32 %v70_v10, %v70_v10 }
  0x9e   :  { %v76_v13 = vsel %vm59_vm0, %v72_v12, 0.0 }
  0x9f   :  { %77 = vadd.xlane.f32.xlu1 %v76_v13  ;;  %v1403_v13 = vmov -1e+30  }
 0x124   :  { %v75_v17 = vpop.xlane.xlu1 %74 }
 0x125   :  { %v79_v18 = vmul.f32 0.03125, %v75_v17 }
 0x127   :  { %v81_v19 = vadd.f32 1e-05, %v79_v18 }
 0x128   :  { %v78_v20 = vpop.xlane.xlu1 %77 }
 0x129   :  { %1332 = vrsqrt.f32 %v81_v19  ;;  %v80_v21 = vmul.f32 0.03125, %v78_v20 }
 0x12b   :  { %v82_v22 = vadd.f32 1e-05, %v80_v21 }
 0x12d   :  { %1334 = vrsqrt.f32 %v82_v22 }
 0x136   :  { %v1333_v23 = vpop.eup %1332 }
 0x137   :  { %v85_v25 = vmul.f32 %v1333_v23, %v69_v6  ;;  %v245_v6 = vlaneseq }
 0x139   :  { %v94_v26 = vmul.f32 %v1127_v24, %v85_v25  ;;  %v246_v7 = vshrl.u32 %v245_v6, 7  ;;  %v249_v8 = vand.u32 127, %v245_v6 }
 0x13a   :  { %v1335_v27 = vpop.eup %1334 }
 0x13b   :  { %v86_v29 = vmul.f32 %v1335_v27, %v70_v10  ;;  %v103_v31 = vadd.f32 %v1128_v28, %v94_v26  ;;  %v254_v9 = vand.u32 1, %v246_v7  ;;  %v278_v10 = vand.u32 1, %v249_v8 }
 0x13c   :  { %v247_v11 = vadd.s32 8, %v246_v7 }
 0x13d   :  { %v95_v30 = vmul.f32 %v1127_v24, %v86_v29  ;;  %v105_v35 = vadd.f32 %v103_v31, %v57_v32  ;;  %vm286_vm3 = vcmp.eq.s32.totalorder %v254_v9, %v278_v10 }
 0x13e   :  { %v261_v12 = vand.u32 1, %v247_v11  ;;  %v288_v14 = vsel %vm286_vm3, 0.0, %v1403_v13 }
 0x13f   :  { %v104_v34 = vadd.f32 %v1128_v28, %v95_v30 }
 0x140   :  { %vm287_vm4 = vcmp.eq.s32.totalorder %v261_v12, %v278_v10 }
 0x141   :  { %v106_v36 = vadd.f32 %v104_v34, %v58_v33  ;;  %v175_v40 = vpack.c.bf16 %v104_v34, %v103_v31  ;;  %v289_v21 = vsel %vm287_vm4, 0.0, %v1403_v13 }
 0x143   :  { %v107_v38 = vpack.c.bf16 %v106_v36, %v105_v35 }
 0x145   :  { %1206 = vmatmul.mubr.msk.bf16.vlgmr.msra.gmra.mxu1 %vm59_vm0, %v107_v38 }
 0x146   :  { %1210 = vmatpush3.bf16.msra.mxu1 %v1318_v37  ;;  %1213 = vmatprep.mubr.msk.bf16.mxu1 %vm1395_vm1, %v1394_v15 }
 0x147   :  { %1211 = vmatprep.subr.bf16.mxu1 %v1394_v15 }
 0x14a   :  { %1212 = vmatpush3.bf16.msra.mxu1 %v1319_v39 }
 0x14b   :  { %1217 = vmatprep.subr.bf16.mxu1 %v1394_v15 }
 0x14d   :  { %1214 = vmatmul.mubr.msk.bf16.vlgmr.msra.gmra.mxu1 %vm59_vm0, %v175_v40 }
 0x14e   :  { %1219 = vmatprep.mubr.msk.bf16.mxu1 %vm1395_vm1, %v1394_v15 }
 0x205   :  { %v168_v41 = vpop.f32.mrf.mxu1 }
 0x206   :  { %v169_v45 = vadd.f32 %v1129_v42, %v168_v41 }
 0x207   :  { %v1207_v43 = vpop.f32.mrf.mxu1 }
 0x209   :  { %v171_v44 = vpop.f32.mrf.mxu1 }
 0x20a   :  { %v172_v46 = vadd.f32 %v1129_v42, %v171_v44 }
 0x20b   :  { %v1208_v47 = vpop.f32.mrf.mxu1 }
 0x20c   :  { %v243_v48 = vpack.c.bf16 %v172_v46, %v169_v45 }
 0x20d   :  { %v236_v49 = vpop.f32.mrf.mxu1 }
 0x20e   :  { %413 = vrot.lane.b32.xlu1 %v243_v48, %s1396_s4  ;;  %291 = vrot.lane.b32.xlu0 %v243_v48, %s1397_s25  ;;  %v237_v53 = vadd.f32 %v1133_v50, %v236_v49 }
 0x20f   :  { %v1215_v51 = vpop.f32.mrf.mxu1 }
 0x211   :  { %v239_v52 = vpop.f32.mrf.mxu1 }
 0x212   :  { %v240_v54 = vadd.f32 %v1133_v50, %v239_v52  ;;  %411 = vrot.lane.b32.xlu1 %v243_v48, %s1398_s3  ;;  %544 = vrot.lane.b32.xlu0 %v243_v48, %s1399_s28 }
 0x213   :  { %v1216_v55 = vpop.f32.mrf.mxu1 }
 0x214   :  { %v1560_v56 = vpack.c.bf16 %v240_v54, %v237_v53 }
 0x216   :  { %546 = vrot.lane.b32.xlu1 %v243_v48, %s1400_s29  ;;  %676 = vrot.lane.b32.xlu0 %v243_v48, %s1401_s2 }
 0x21a   :  { %678 = vrot.lane.b32.xlu1 %v243_v48, %s1402_s30 }
 0x280   :  { %v414_v57 = vpop.permute.xlu1 %413  ;;  %v292_v58 = vpop.permute.xlu0 %291 }
 0x281   :  { %v298_v59 = vsel %vm293_vm2, %v292_v58, 0  ;;  %v419_v60 = vsel %vm293_vm2, %v414_v57, 0 }
 0x282   :  { %1218 = vmatpush3.bf16.xpose.msra.mxu1 %v298_v59  ;;  %1230 = vmatpush3.bf16.xpose.msra.mxu0 %v419_v60 }
 0x283   :  { %1223 = vmatprep.subr.bf16.mxu1 %v1394_v15  ;;  %1241 = vmatprep.subr.bf16.mxu0 %v1394_v15 }
 0x284   :  { %v412_v61 = vpop.permute.xlu1 %411  ;;  %v545_v3 = vpop.permute.xlu0 %544 }
 0x288   :  { %v547_v62 = vpop.permute.xlu1 %546  ;;  %v677_v5 = vpop.permute.xlu0 %676 }
 0x289   :  { %v552_v63 = vsel %vm293_vm2, %v547_v62, 0  ;;  %1220 = vmatmul.mubr.msk.bf16.vlgmr.msra.gmra.mxu1 %vm293_vm2, %v243_v48  ;;  %1232 = vmatmul.mubr.msk.bf16.vlgmr.msra.gmra.mxu0 %vm293_vm2, %v412_v61 }
 0x28a   :  { %1224 = vmatpush3.bf16.msra.mxu1 %v1560_v56  ;;  %1242 = vmatpush3.bf16.xpose.msra.mxu0 %v552_v63 }
 0x28b   :  { %1243 = vmatprep.mubr.msk.bf16.mxu0 %vm1395_vm1, %v1394_v15  ;;  %1253 = vmatprep.subr.bf16.mxu0 %v1394_v15 }
 0x28c   :  { %1225 = vmatprep.mubr.msk.bf16.mxu1 %vm1395_vm1, %v1394_v15  ;;  %1235 = vmatprep.subr.bf16.mxu1 %v1394_v15  ;;  %v679_v2 = vpop.permute.xlu1 %678 }
 0x28d   :  { %v684_v4 = vsel %vm293_vm2, %v679_v2, 0 }
 0x291   :  { %1244 = vmatmul.mubr.msk.bf16.vlgmr.msra.gmra.mxu0 %vm293_vm2, %v545_v3 }
 0x292   :  { %1254 = vmatpush3.bf16.xpose.msra.mxu0 %v684_v4  ;;  %1255 = vmatprep.mubr.msk.bf16.mxu0 %vm1395_vm1, %v1394_v15 }
 0x293   :  { %1265 = vmatprep.subr.bf16.mxu0 %v1394_v15 }
 0x299   :  { %1256 = vmatmul.mubr.msk.bf16.vlgmr.msra.gmra.mxu0 %vm293_vm2, %v677_v5 }
 0x29a   :  { %1269 = vmatprep.mubr.msk.bf16.mxu0 %vm1395_vm1, %v1394_v15 }
 0x349   :  { %v334_v16 = vpop.f32.mrf.mxu1  ;;  %v455_v17 = vpop.f32.mrf.mxu0 }
 0x34a   :  { %v335_v18 = vadd.f32 %v334_v16, %v288_v14  ;;  %v1586_v28 = vadd.f32 %v455_v17, %v288_v14 }
 0x34b   :  { %v1221_v19 = vpop.f32.mrf.mxu1  ;;  %v1233_v20 = vpop.f32.mrf.mxu0 }
 0x34c   :  { %v342_v22 = vsel %vm341_vm5, %v335_v18, -inf  ;;  %v462_v35 = vsel %vm341_vm5, %v1586_v28, -inf }
 0x34d   :  { %v458_v23 = vpop.f32.mrf.mxu0  ;;  %343 = vmax.xlane.f32.xlu1 %v342_v22  ;;  %v337_v24 = vpop.f32.mrf.mxu1 }
 0x34e   :  { %v338_v25 = vadd.f32 %v337_v24, %v289_v21  ;;  %v459_v33 = vadd.f32 %v458_v23, %v289_v21 }
 0x34f   :  { %v1222_v26 = vpop.f32.mrf.mxu1  ;;  %v1234_v27 = vpop.f32.mrf.mxu0 }
 0x350   :  { %v345_v29 = vsel %vm341_vm5, %v338_v25, -inf  ;;  %v465_v39 = vsel %vm341_vm5, %v459_v33, -inf }
 0x351   :  { %v588_v30 = vpop.f32.mrf.mxu0  ;;  %346 = vmax.xlane.f32.xlu0 %v345_v29 }
 0x352   :  { %v1589_v31 = vadd.f32 %v588_v30, %v288_v14 }
 0x353   :  { %v1245_v32 = vpop.f32.mrf.mxu0 }
 0x354   :  { %v595_v34 = vsel %vm341_vm5, %v1589_v31, -inf }
 0x355   :  { %v591_v36 = vpop.f32.mrf.mxu0  ;;  %596 = vmax.xlane.f32.xlu1 %v595_v34  ;;  %463 = vmax.xlane.f32.xlu0 %v462_v35 }
 0x356   :  { %v592_v38 = vadd.f32 %v591_v36, %v289_v21 }
 0x357   :  { %v1246_v37 = vpop.f32.mrf.mxu0 }
 0x358   :  { %v598_v44 = vsel %vm341_vm5, %v592_v38, -inf }
 0x359   :  { %v720_v40 = vpop.f32.mrf.mxu0  ;;  %466 = vmax.xlane.f32.xlu0 %v465_v39 }
 0x35a   :  { %v721_v41 = vadd.f32 %v720_v40, %v288_v14 }
 0x35b   :  { %v1257_v42 = vpop.f32.mrf.mxu0 }
 0x35c   :  { %v727_v43 = vsel %vm341_vm5, %v721_v41, -inf }
 0x35d   :  { %v723_v45 = vpop.f32.mrf.mxu0  ;;  %728 = vmax.xlane.f32.xlu1 %v727_v43  ;;  %599 = vmax.xlane.f32.xlu0 %v598_v44 }
 0x35e   :  { %v724_v46 = vadd.f32 %v723_v45, %v289_v21 }
 0x35f   :  { %v1258_v47 = vpop.f32.mrf.mxu0 }
 0x360   :  { %v730_v48 = vsel %vm341_vm5, %v724_v46, -inf }
 0x361   :  { %731 = vmax.xlane.f32.xlu0 %v730_v48 }
 0x3d6   :  { %v344_v49 = vpop.xlane.xlu1 %343 }
 0x3d7   :  { %v348_v50 = vsub.f32 %v335_v18, %v344_v49 }
 0x3d9   :  { %v350_v51 = vmul.f32 1.442695, %v348_v50 }
 0x3da   :  { %v347_v52 = vpop.xlane.xlu0 %346 }
 0x3db   :  { %1336 = vpow2.f32 %v350_v51  ;;  %v349_v53 = vsub.f32 %v338_v25, %v347_v52 }
 0x3dd   :  { %v352_v54 = vmul.f32 1.442695, %v349_v53 }
 0x3de   :  { %v464_v55 = vpop.xlane.xlu0 %463  ;;  %v597_v16 = vpop.xlane.xlu1 %596 }
 0x3df   :  { %1338 = vpow2.f32 %v352_v54  ;;  %v468_v14 = vsub.f32 %v1586_v28, %v464_v55  ;;  %v601_v17 = vsub.f32 %v1589_v31, %v597_v16 }
 0x3e1   :  { %v470_v18 = vmul.f32 1.442695, %v468_v14  ;;  %v603_v20 = vmul.f32 1.442695, %v601_v17 }
 0x3e2   :  { %v467_v57 = vpop.xlane.xlu0 %466 }
 0x3e3   :  { %v469_v58 = vsub.f32 %v459_v33, %v467_v57 }
 0x3e5   :  { %v472_v59 = vmul.f32 1.442695, %v469_v58 }
 0x3e6   :  { %v600_v60 = vpop.xlane.xlu0 %599  ;;  %v729_v19 = vpop.xlane.xlu1 %728 }
 0x3e7   :  { %1340 = vpow2.f32 %v472_v59  ;;  %v602_v61 = vsub.f32 %v592_v38, %v600_v60  ;;  %v733_v21 = vsub.f32 %v721_v41, %v729_v19 }
 0x3e8   :  { %v1337_v62 = vpop.eup %1336 }
 0x3e9   :  { %v605_v63 = vmul.f32 1.442695, %v602_v61  ;;  %v354_v2 = vsel %vm341_vm5, %v1337_v62, 0.0  ;;  %v735_v22 = vmul.f32 1.442695, %v733_v21 }
 0x3ea   :  { %355 = vadd.xlane.f32.xlu1 %v354_v2  ;;  %v732_v3 = vpop.xlane.xlu0 %731 }
 0x3eb   :  { %v734_v4 = vsub.f32 %v724_v46, %v732_v3  ;;  %1342 = vpow2.f32 %v605_v63 }
 0x3ec   :  { %v1339_v5 = vpop.eup %1338 }
 0x3ed   :  { %v737_v6 = vmul.f32 1.442695, %v734_v4  ;;  %v357_v7 = vsel %vm341_vm5, %v1339_v5, 0.0 }
 0x3ee   :  { %358 = vadd.xlane.f32.xlu0 %v357_v7  ;;  %v1320_v7 = vld [vmem:[%s1735_s6 + $0x8] sm:$0xff]  }
 0x3ef   :  { %1344 = vpow2.f32 %v737_v6  ;;  %1266 = vmatpush3.bf16.msra.mxu0 %v1320_v7  ;;  %v1329_v7 = vld [vmem:[%s1743_s14 + $0x10] sm:$0xff]  }
 0x3f0   :  { %1346 = vpow2.f32 %v470_v18  ;;  %1267 = vmatprep.subr.bf16.mxu0 %v1394_v15 }
 0x3f1   :  { %1348 = vpow2.f32 %v603_v20 }
 0x3f2   :  { %1350 = vpow2.f32 %v735_v22 }
 0x3f4   :  { %v1341_v8 = vpop.eup %1340 }
 0x3f5   :  { %v477_v9 = vsel %vm341_vm5, %v1341_v8, 0.0 }
 0x3f6   :  { %478 = vadd.xlane.f32.xlu0 %v477_v9  ;;  %v1321_v9 = vld [vmem:[%s1735_s6] sm:$0xff]  }
 0x3f7   :  { %1268 = vmatpush3.bf16.msra.mxu0 %v1321_v9  ;;  %v1331_v9 = vld [vmem:[%s1743_s14] sm:$0xff]  }
 0x3f8   :  { %v1602_v10 = vpop.eup %1342  ;;  %1281 = vmatprep.subr.bf16.mxu0 %v1394_v15 }
 0x3f9   :  { %v610_v11 = vsel %vm341_vm5, %v1602_v10, 0.0 }
 0x3fa   :  { %611 = vadd.xlane.f32.xlu0 %v610_v11 }
 0x3fb   :  { %486 = vrot.lane.b32.xlu1 %v1560_v56, %s1398_s3 }
 0x3fc   :  { %v1608_v12 = vpop.eup %1344 }
 0x3fd   :  { %v742_v13 = vsel %vm341_vm5, %v1608_v12, 0.0  ;;  %v1347_v23 = vpop.eup %1346 }
 0x3fe   :  { %743 = vadd.xlane.f32.xlu0 %v742_v13  ;;  %v474_v24 = vsel %vm341_vm5, %v1347_v23, 0.0  ;;  %v1349_v25 = vpop.eup %1348 }
 0x3ff   :  { %v607_v26 = vsel %vm341_vm5, %v1349_v25, 0.0  ;;  %v1351_v27 = vpop.eup %1350 }
 0x400   :  { %v739_v28 = vsel %vm341_vm5, %v1351_v27, 0.0 }
 0x414   :  { %618 = vrot.lane.b32.xlu0 %v1560_v56, %s1399_s28 }
 0x41f   :  { %475 = vadd.xlane.f32.xlu1 %v474_v24 }
 0x423   :  { %608 = vadd.xlane.f32.xlu1 %v607_v26  ;;  %v1145_v26 = vld [vmem:[%s1736_s7] ss:$0 sm:$0xff] }
 0x427   :  { %740 = vadd.xlane.f32.xlu1 %v739_v28 }
 0x438   :  { %750 = vrot.lane.b32.xlu1 %v1560_v56, %s1401_s2 }
 0x473   :  { %v356_v29 = vpop.xlane.xlu1 %355 }
 0x474   :  { %1352 = vrcp.f32 %v356_v29 }
 0x477   :  { %v359_v30 = vpop.xlane.xlu0 %358  ;;  %v487_v36 = vpop.permute.xlu1 %486 }
 0x478   :  { %1354 = vrcp.f32 %v359_v30 }
 0x47f   :  { %v479_v37 = vpop.xlane.xlu0 %478 }
 0x480   :  { %1356 = vrcp.f32 %v479_v37 }
 0x481   :  { %v1353_v31 = vpop.eup %1352 }
 0x482   :  { %v361_v33 = vmul.f32 %v1353_v31, %v1337_v62 }
 0x483   :  { %v612_v38 = vpop.xlane.xlu0 %611 }
 0x485   :  { %v1355_v32 = vpop.eup %1354 }
 0x486   :  { %v363_v34 = vmul.f32 %v1355_v32, %v1339_v5 }
 0x487   :  { %v744_v42 = vpop.xlane.xlu0 %743 }
 0x488   :  { %v364_v35 = vpack.c.bf16 %v363_v34, %v361_v33 }
 0x48a   :  { %1226 = vmatmul.mubr.msk.bf16.vlgmr.msra.gmra.mxu1 %vm341_vm5, %v364_v35 }
 0x48b   :  { %1236 = vmatpush3.bf16.msra.mxu1 %v487_v36  ;;  %1237 = vmatprep.mubr.msk.bf16.mxu1 %vm1395_vm1, %v1394_v15  ;;  %v619_v48 = vpop.permute.xlu0 %618 }
 0x48c   :  { %1247 = vmatprep.subr.bf16.mxu1 %v1394_v15 }
 0x48d   :  { %v1357_v41 = vpop.eup %1356 }
 0x48e   :  { %v483_v45 = vmul.f32 %v1357_v41, %v1341_v8 }
 0x4a8   :  { %v476_v56 = vpop.xlane.xlu1 %475 }
 0x4a9   :  { %1358 = vrcp.f32 %v476_v56 }
 0x4ac   :  { %v609_v39 = vpop.xlane.xlu1 %608 }
 0x4ad   :  { %1360 = vrcp.f32 %v609_v39 }
 0x4ae   :  { %1362 = vrcp.f32 %v612_v38 }
 0x4b0   :  { %v741_v40 = vpop.xlane.xlu1 %740 }
 0x4b1   :  { %1364 = vrcp.f32 %v741_v40 }
 0x4b2   :  { %1366 = vrcp.f32 %v744_v42 }
 0x4b4   :  { %v751_v54 = vpop.permute.xlu1 %750 }
 0x4b6   :  { %v1359_v43 = vpop.eup %1358 }
 0x4b7   :  { %v481_v44 = vmul.f32 %v1359_v43, %v1347_v23 }
 0x4b9   :  { %v484_v46 = vpack.c.bf16 %v483_v45, %v481_v44  ;;  %v1322_v44 = vld [vmem:[%s1741_s12 + $0x8] sm:$0xff]   ;;  %v1323_v45 = vld [vmem:[%s1741_s12] sm:$0xff]  }
 0x4ba   :  { %v1361_v47 = vpop.eup %1360 }
 0x4bb   :  { %1238 = vmatmul.mubr.msk.bf16.vlgmr.msra.gmra.mxu1 %vm341_vm5, %v484_v46  ;;  %v1363_v49 = vpop.eup %1362  ;;  %v614_v50 = vmul.f32 %v1361_v47, %v1349_v25  ;;  %v1324_v46 = vld [vmem:[%s1743_s14 + $0x38] sm:$0xff]   ;;  %v1325_v47 = vld [vmem:[%s1743_s14 + $0x30] sm:$0xff]  }
 0x4bc   :  { %1248 = vmatpush3.bf16.msra.mxu1 %v619_v48  ;;  %1249 = vmatprep.mubr.msk.bf16.mxu1 %vm1395_vm1, %v1394_v15  ;;  %v616_v51 = vmul.f32 %v1363_v49, %v1602_v10  ;;  %v1326_v48 = vld [vmem:[%s1743_s14 + $0x28] sm:$0xff]   ;;  %v1327_v49 = vld [vmem:[%s1743_s14 + $0x20] sm:$0xff]  }
 0x4bd   :  { %1259 = vmatprep.subr.bf16.mxu1 %v1394_v15 }
 0x4be   :  { %v617_v52 = vpack.c.bf16 %v616_v51, %v614_v50  ;;  %v1365_v53 = vpop.eup %1364  ;;  %v1328_v50 = vld [vmem:[%s1743_s14 + $0x18] sm:$0xff]  }
 0x4bf   :  { %v1367_v55 = vpop.eup %1366  ;;  %v746_v57 = vmul.f32 %v1365_v53, %v1351_v27 }
 0x4c0   :  { %v748_v58 = vmul.f32 %v1367_v55, %v1608_v12 }
 0x4c2   :  { %v749_v59 = vpack.c.bf16 %v748_v58, %v746_v57 }
 0x4c3   :  { %1250 = vmatmul.mubr.msk.bf16.vlgmr.msra.gmra.mxu1 %vm341_vm5, %v617_v52 }
 0x4c4   :  { %1260 = vmatpush3.bf16.msra.mxu1 %v751_v54  ;;  %1261 = vmatprep.mubr.msk.bf16.mxu1 %vm1395_vm1, %v1394_v15 }
 0x4c5   :  { %1273 = vmatprep.subr.bf16.mxu1 %v1394_v15 }
 0x4cb   :  { %1262 = vmatmul.mubr.msk.bf16.vlgmr.msra.gmra.mxu1 %vm341_vm5, %v749_v59 }
 0x4cc   :  { %1277 = vmatprep.mubr.msk.bf16.mxu1 %vm1395_vm1, %v1394_v15  ;;  %1274 = vmatpush3.bf16.msra.mxu1 %v1322_v44 }
 0x4cd   :  { %1275 = vmatprep.subr.bf16.mxu1 %v1394_v15 }
 0x4d0   :  { %1276 = vmatpush3.bf16.msra.mxu1 %v1323_v45 }
 0x54a   :  { %v402_v60 = vpop.f32.mrf.mxu1 }
 0x54b   :  { %409 = vst.msk [vmem:[#allocation2] sm:$0xff] %vm293_vm2, %v402_v60  ;;  %v1149_v60 = vld [vmem:[%s1739_s10] ss:$0 sm:$0xff] }
 0x54c   :  { %v1227_v61 = vpop.f32.mrf.mxu1 }
 0x54e   :  { %v405_v62 = vpop.f32.mrf.mxu1 }
 0x54f   :  { %410 = vst.msk [vmem:[#allocation2 + $0x8] sm:$0xff] %vm293_vm2, %v405_v62 }
 0x550   :  { %v1228_v63 = vpop.f32.mrf.mxu1 }
 0x57b   :  { %v526_v2 = vpop.f32.mrf.mxu1 }
 0x57c   :  { %535 = vrot.lane.b32.xlu1 %v526_v2, %s1404_s5  ;;  %v1150_v2 = vld [vmem:[%s1740_s11] ss:$0 sm:$0xff] }
 0x57d   :  { %v1239_v3 = vpop.f32.mrf.mxu1 }
 0x57f   :  { %v529_v4 = vpop.f32.mrf.mxu1 }
 0x580   :  { %537 = vrot.lane.b32.xlu1 %v529_v4, %s1404_s5 }
 0x581   :  { %v1240_v5 = vpop.f32.mrf.mxu1 }
 0x583   :  { %v658_v6 = vpop.f32.mrf.mxu1 }
 0x584   :  { %667 = vrot.lane.b32.xlu0 %v658_v6, %s1405_s18 }
 0x585   :  { %v1251_v8 = vpop.f32.mrf.mxu1 }
 0x586   :  { %v1330_v8 = vld [vmem:[%s1743_s14 + $0x8] sm:$0xff]  }
 0x587   :  { %v661_v10 = vpop.f32.mrf.mxu1 }
 0x588   :  { %669 = vrot.lane.b32.xlu1 %v661_v10, %s1405_s18  ;;  %v1151_v10 = vld [vmem:[%s1742_s13] ss:$0 sm:$0xff]  ;;  %s1407_s13 = smov [#allocation3]  }
 0x589   :  { %v1252_v11 = vpop.f32.mrf.mxu1  ;;  %s1116_s14 = sshll.u32 %s1407_s13, 4  ;;  %s1117_s14 = int_to_ptr.vmem [resolvable:$true] %s1116_s14 }
 0x58a   :  { %s1372_s9 = scalar_lea.vmem %s1117_s14, 256  ;;  %p1377_p1 = scmp.lt.s32.totalorder %s1117_s14, %s1117_s14 }
 0x58b   :  { %v790_v12 = vpop.f32.mrf.mxu1  ;;  %p1373_p0 = scmp.ne.s32.totalorder %s1117_s14, %s1372_s9  ;;  %p1378_p2 = scmp.lt.s32.totalorder %s1372_s9, %s1372_s9 }
 0x58c   :  { %799 = vrot.lane.b32.xlu0 %v790_v12, %s1406_s21 }
 0x58d   :  { %v1263_v13 = vpop.f32.mrf.mxu1  ;;  %p1379_p3 = por %p1378_p2, %p1377_p1 }
 0x58f   :  { %v793_v14 = vpop.f32.mrf.mxu1  ;;  %p1380_p4 = pnand %p1379_p3, %p1373_p0 }
 0x590   :  { %801 = vrot.lane.b32.xlu1 %v793_v14, %s1406_s21 }
 0x591   :  { %v1264_v16 = vpop.f32.mrf.mxu1 }
 0x5ee   :  { %v536_v17 = vpop.permute.xlu1 %535 }
 0x5ef   :  { %542 = vst.msk [vmem:[#allocation2] sm:$0xff] %vm541_vm6, %v536_v17 }
 0x5f2   :  { %v538_v18 = vpop.permute.xlu1 %537 }
 0x5f3   :  { %543 = vst.msk [vmem:[#allocation2 + $0x8] sm:$0xff] %vm541_vm6, %v538_v18 }
 0x5f6   :  { %v668_v19 = vpop.permute.xlu0 %667 }
 0x5f7   :  { %674 = vst.msk [vmem:[#allocation2] sm:$0xff] %vm673_vm7, %v668_v19 }
 0x5fa   :  { %v670_v20 = vpop.permute.xlu1 %669 }
 0x5fb   :  { %675 = vst.msk [vmem:[#allocation2 + $0x8] sm:$0xff] %vm673_vm7, %v670_v20 }
 0x5fe   :  { %v800_v21 = vpop.permute.xlu0 %799 }
 0x5ff   :  { %806 = vst.msk [vmem:[#allocation2] sm:$0xff] %vm805_vm8, %v800_v21 }
 0x602   :  { %v802_v22 = vpop.permute.xlu1 %801 }
 0x603   :  { %807 = vst.msk [vmem:[#allocation2 + $0x8] sm:$0xff] %vm805_vm8, %v802_v22 }
 0x606   :  { %v808_v23 = vld [vmem:[#allocation2] sm:$0xff] }
 0x60a   :  { %v809_v24 = vld [vmem:[#allocation2 + $0x8] sm:$0xff] }
 0x60b   :  { %v810_v25 = vpack.c.bf16 %v809_v24, %v808_v23 }
 0x60d   :  { %1270 = vmatmul.mubr.msk.bf16.vlgmr.msra.gmra.mxu0 %vm59_vm0, %v810_v25 }
 0x60e   :  { %1297 = vmatprep.mubr.msk.bf16.mxu0 %vm1395_vm1, %v1394_v15  ;;  %1282 = vmatpush3.bf16.msra.mxu0 %v1324_v46 }
 0x60f   :  { %1283 = vmatprep.subr.bf16.mxu0 %v1394_v15 }
 0x612   :  { %1284 = vmatpush3.bf16.msra.mxu0 %v1325_v47 }
 0x613   :  { %1285 = vmatprep.subr.bf16.mxu0 %v1394_v15 }
 0x616   :  { %1286 = vmatpush3.bf16.msra.mxu0 %v1326_v48 }
 0x617   :  { %1287 = vmatprep.subr.bf16.mxu0 %v1394_v15 }
 0x61a   :  { %1288 = vmatpush3.bf16.msra.mxu0 %v1327_v49 }
 0x61b   :  { %1289 = vmatprep.subr.bf16.mxu0 %v1394_v15 }
 0x61e   :  { %1290 = vmatpush3.bf16.msra.mxu0 %v1328_v50 }
 0x61f   :  { %1291 = vmatprep.subr.bf16.mxu0 %v1394_v15 }
 0x622   :  { %1292 = vmatpush3.bf16.msra.mxu0 %v1329_v7 }
 0x623   :  { %1293 = vmatprep.subr.bf16.mxu0 %v1394_v15 }
 0x626   :  { %1294 = vmatpush3.bf16.msra.mxu0 %v1330_v8 }
 0x627   :  { %1295 = vmatprep.subr.bf16.mxu0 %v1394_v15  ;;  %v1155_v15 = vld [vmem:[%s1744_s15] ss:$0 sm:$0xff] }
 0x62a   :  { %1296 = vmatpush3.bf16.msra.mxu0 %v1331_v9 }
 0x6cd   :  { %v871_v27 = vpop.f32.mrf.mxu0 }
 0x6ce   :  { %v872_v28 = vadd.f32 %v1145_v26, %v871_v27 }
 0x6cf   :  { %v1271_v29 = vpop.f32.mrf.mxu0 }
 0x6d0   :  { %v1657_v30 = vadd.f32 %v872_v28, %v1497_v0 }
 0x6d1   :  { %v874_v31 = vpop.f32.mrf.mxu0 }
 0x6d2   :  { %v875_v32 = vadd.f32 %v1145_v26, %v874_v31  ;;  %v880_v33 = vsel %vm59_vm0, %v1657_v30, 0.0 }
 0x6d3   :  { %881 = vadd.xlane.f32.xlu0 %v880_v33  ;;  %v1272_v34 = vpop.f32.mrf.mxu0 }
 0x6d4   :  { %v1662_v35 = vadd.f32 %v875_v32, %v1502_v1 }
 0x6d6   :  { %v883_v36 = vsel %vm59_vm0, %v1662_v35, 0.0 }
 0x6d7   :  { %884 = vadd.xlane.f32.xlu1 %v883_v36 }
 0x75c   :  { %v882_v37 = vpop.xlane.xlu0 %881 }
 0x75d   :  { %v886_v56 = vmul.f32 0.03125, %v882_v37 }
 0x75f   :  { %v888_v38 = vsub.f32 %v1657_v30, %v886_v56 }
 0x760   :  { %v885_v0 = vpop.xlane.xlu1 %884 }
 0x761   :  { %v887_v39 = vmul.f32 0.03125, %v885_v0  ;;  %v890_v40 = vmul.f32 %v888_v38, %v888_v38 }
 0x763   :  { %v889_v41 = vsub.f32 %v1662_v35, %v887_v39  ;;  %v892_v42 = vsel %vm59_vm0, %v890_v40, 0.0 }
 0x764   :  { %893 = vadd.xlane.f32.xlu0 %v892_v42 }
 0x765   :  { %v891_v43 = vmul.f32 %v889_v41, %v889_v41 }
 0x767   :  { %v895_v1 = vsel %vm59_vm0, %v891_v43, 0.0 }
 0x768   :  { %896 = vadd.xlane.f32.xlu0 %v895_v1 }
 0x7ed   :  { %v894_v51 = vpop.xlane.xlu0 %893 }
 0x7ee   :  { %v898_v52 = vmul.f32 0.03125, %v894_v51 }
 0x7f0   :  { %v900_v53 = vadd.f32 1e-05, %v898_v52 }
 0x7f1   :  { %v897_v54 = vpop.xlane.xlu0 %896 }
 0x7f2   :  { %1368 = vrsqrt.f32 %v900_v53  ;;  %v899_v55 = vmul.f32 0.03125, %v897_v54 }
 0x7f4   :  { %v901_v57 = vadd.f32 1e-05, %v899_v55 }
 0x7f6   :  { %1370 = vrsqrt.f32 %v901_v57 }
 0x7ff   :  { %v1369_v58 = vpop.eup %1368 }
 0x800   :  { %v904_v59 = vmul.f32 %v1369_v58, %v888_v38 }
 0x802   :  { %v913_v63 = vmul.f32 %v1149_v60, %v904_v59 }
 0x803   :  { %v1371_v61 = vpop.eup %1370 }
 0x804   :  { %v905_v62 = vmul.f32 %v1371_v61, %v889_v41  ;;  %v922_v4 = vadd.f32 %v1150_v2, %v913_v63 }
 0x806   :  { %v914_v3 = vmul.f32 %v1149_v60, %v905_v62 }
 0x808   :  { %v923_v5 = vadd.f32 %v1150_v2, %v914_v3 }
 0x80a   :  { %v924_v6 = vpack.c.bf16 %v923_v5, %v922_v4 }
 0x80c   :  { %1278 = vmatmul.mubr.msk.bf16.vlgmr.msra.gmra.mxu1 %vm59_vm0, %v924_v6 }
 0x8cc   :  { %v985_v11 = vpop.f32.mrf.mxu1 }
 0x8cd   :  { %v986_v13 = vadd.f32 %v1151_v10, %v985_v11 }
 0x8ce   :  { %v1279_v12 = vpop.f32.mrf.mxu1 }
 0x8cf   :  { %v992_v18 = vmax.f32 %v986_v13, 0.0 }
 0x8d0   :  { %v988_v14 = vpop.f32.mrf.mxu1 }
 0x8d1   :  { %v989_v16 = vadd.f32 %v1151_v10, %v988_v14 }
 0x8d2   :  { %v1280_v17 = vpop.f32.mrf.mxu1 }
 0x8d3   :  { %v993_v19 = vmax.f32 %v989_v16, 0.0 }
 0x8d5   :  { %v994_v20 = vpack.c.bf16 %v993_v19, %v992_v18 }
 0x8d7   :  { %1298 = vmatmul.mubr.bf16.vlgmr.msra.gmra.mxu0 %v994_v20 }
 0x997   :  { %v1100_v21 = vpop.f32.mrf.mxu0 }
 0x998   :  { %v1101_v22 = vadd.f32 %v1155_v15, %v1100_v21 }
 0x999   :  { %v1299_v23 = vpop.f32.mrf.mxu0 }
 0x99a   :  { %v1107_v24 = vadd.f32 %v1101_v22, %v1657_v30 }
 0x99b   :  { %v1103_v25 = vpop.f32.mrf.mxu0 }
 0x99c   :  { %1109 = vst.msk [vmem:[#allocation3] sm:$0xff] %vm59_vm0, %v1107_v24  ;;  %v1104_v26 = vadd.f32 %v1155_v15, %v1103_v25 }
 0x99d   :  { %v1300_v27 = vpop.f32.mrf.mxu0 }
 0x99e   :  { %v1108_v28 = vadd.f32 %v1104_v26, %v1662_v35 }
 0x9a0   :  { %1110 = vst.msk [vmem:[#allocation3 + $0x8] sm:$0xff] %vm59_vm0, %v1108_v28 }
 0x9a1   :  { %1383 = shalt.err (!%p1380_p4)
}
 0x9a2   :  { %s1408_s15 = smov 128  }
 0x9a3   :  { %1122 = dma.vmem_to_hbm [thread:$0]  %s1117_s14, 256, %s1745_s16, [#allocation4], %s1408_s15, %s1408_s15, %s1404_s5  }
 0x9a4   :  { %1392 = dma.done.wait [#allocation4], 256  }
 0x9a5   :  { %1393 = vsyncadd [#allocation4], 4294967040 }
 0x9a6   :  { %1126 = vsyncpa [#allocation4], 1 }

</bundles_post_ra>
